<compile_context>
chip_gen: v7x
topology: tpu7x:2x2x1
jax: 0.10.0
libtpu: 0.0.40
codegen_flags: <defaults>
</compile_context>

<pallas_src>
import functools

import jax
import jax.numpy as jnp
from jax.experimental import pallas as pl
from jax.experimental.pallas import tpu as pltpu


def _round_up(x, m):
    return (x + m - 1) // m * m


def _sublane(dtype):
    # Sublane packing of the second-to-last block dim per dtype width.
    return {4: 8, 2: 16, 1: 32}.get(jnp.dtype(dtype).itemsize, 8)


def _device_profile():
    """Returns (target input-tile bytes per grid step, bf16-native-compute ok)."""
    kind = ""
    try:
        kind = jax.devices()[0].device_kind.lower()
    except Exception:
        pass
    is_v5e = ("v5e" in kind) or ("v5 lite" in kind) or ("v5lite" in kind)
    is_v7 = "v7" in kind
    # v7x: ~3.2 TB/s HBM -> bigger tiles amortize the ~0.35 us per-step cost.
    tile_bytes = (8 << 20) if is_v7 else (4 << 20)
    # v5e has no bf16 VPU/EUP -> upcast bf16 compute to f32 there.
    return tile_bytes, (not is_v5e)


def _block_vmem_bytes(block_rows, block_cols, dtype):
    sub = _sublane(dtype)
    return (_round_up(block_rows, sub) * _round_up(block_cols, 128)
            * jnp.dtype(dtype).itemsize)


def _plan_rows(rows, cols, bytes_per_elem, sub, tile_bytes_target):
    """Pick (tm, n_steps): row-block size (multiple of `sub`) and grid size."""
    if rows <= sub:
        return rows, 1                               # single full-dim block
    tm_cap = max(sub, (tile_bytes_target // (cols * bytes_per_elem)) // sub * sub)
    n_steps = pl.cdiv(rows, tm_cap)
    # Mid-size inputs: still split in two so a 2-TensorCore chip (v7x) can use
    # both cores; prefer an even step count for an even megacore split.
    if n_steps == 1 and rows >= 2 * sub and rows * cols * bytes_per_elem >= (1 << 20):
        n_steps = 2
    if n_steps > 1 and n_steps % 2:
        n_steps += 1
    tm = max(sub, (pl.cdiv(rows, n_steps) // sub) * sub)
    return tm, pl.cdiv(rows, tm)


def _soft_compare_kernel(alpha_ref, inv_scale_ref, x_ref, o_ref, *, compute_dtype):
    # x_ref/o_ref: lane-dense 2-D tile of the (flattened) input.
    # alpha_ref / inv_scale_ref: shape-(1,) f32 scalars in SMEM.
    a = alpha_ref[0].astype(compute_dtype)
    s = inv_scale_ref[0].astype(compute_dtype)
    z = (x_ref[...].astype(compute_dtype) - a) * s
    # sigmoid(z) == 0.5 * tanh(0.5 * z) + 0.5 : one EUP transcendental,
    # no VALU divide (EUP slot is otherwise idle in this elementwise kernel).
    y = 0.5 * jnp.tanh(0.5 * z) + 0.5
    o_ref[...] = y.astype(o_ref.dtype)


def soft_compare_forward(x, alpha, beta):
    """Pallas forward for SoftCompare: sigmoid((x - alpha) / exp(beta)).

    :param x: input of arbitrary shape (elementwise op)
    :param alpha, beta: shape-(1,) parameters (as in the nn.Module)
    Returns x.dtype for floating inputs, float32 for integer/bool inputs.
    """
    orig_shape = x.shape
    total = int(x.size)

    tile_bytes, native_bf16 = _device_profile()

    x_dtype = jnp.dtype(x.dtype)
    if not jnp.issubdtype(x_dtype, jnp.floating):
        out_dtype, compute_dtype = jnp.dtype(jnp.float32), jnp.float32
    elif x_dtype == jnp.dtype(jnp.bfloat16) and native_bf16:
        out_dtype, compute_dtype = x_dtype, jnp.bfloat16
    elif x_dtype == jnp.dtype(jnp.float32):
        out_dtype, compute_dtype = x_dtype, jnp.float32
    else:
        out_dtype, compute_dtype = x_dtype, jnp.float32

    if total == 0:
        return jnp.zeros(orig_shape, out_dtype)

    # Scalar parameters in SMEM: alpha and 1/exp(beta) (scalar-only math here).
    alpha_s = jnp.asarray(alpha, dtype=jnp.float32).reshape(-1)[:1]
    inv_scale_s = jnp.exp(-jnp.asarray(beta, dtype=jnp.float32).reshape(-1)[:1])

    in_item = x_dtype.itemsize
    out_item = jnp.dtype(out_dtype).itemsize
    sub = max(_sublane(x_dtype), _sublane(out_dtype))
    bytes_per_elem = max(in_item, out_item)

    # ---- Zero-copy 2-D view of the flattened input -------------------------
    cols = 0
    for c in (1024, 512, 256, 128):
        if total % c == 0:
            cols = c
            break

    if cols:
        # Lane-dense main path: (rows, cols) view, grid over row blocks.
        rows = total // cols
        tm, n_steps = _plan_rows(rows, cols, bytes_per_elem, sub, tile_bytes)
        view_shape = (rows, cols)
        block_shape = (tm, cols)
        index_map = lambda i: (i, 0)
    else:
        # Ragged fallback (total not a multiple of 128): (1, total) row view
        # tiled along the lane axis.  Still zero-copy; sublane-sparse, so only
        # used when no 128-divisible factorization exists.
        tc = min(64 * 1024, _round_up(total, 128))
        n_steps = pl.cdiv(total, tc)
        view_shape = (1, total)
        block_shape = (1, tc)
        index_map = lambda i: (0, i)

    x2d = x.reshape(view_shape)          # free (contiguous reshape)

    # Explicit VMEM budget: double-buffered input + output blocks + headroom,
    # capped under v7x's 64 MiB per-TC VMEM; also overrides v5e's 16 MiB
    # default scoped limit.
    in_blk = _block_vmem_bytes(block_shape[0], block_shape[1], x_dtype)
    out_blk = _block_vmem_bytes(block_shape[0], block_shape[1], out_dtype)
    vmem_limit = int(max(16 << 20, min(48 << 20, 2 * (in_blk + out_blk) + (8 << 20))))

    kernel = functools.partial(_soft_compare_kernel, compute_dtype=compute_dtype)

    y2d = pl.pallas_call(
        kernel,
        out_shape=jax.ShapeDtypeStruct(view_shape, out_dtype),
        grid=(n_steps,),
        in_specs=[
            pl.BlockSpec(memory_space=pltpu.MemorySpace.SMEM),   # alpha
            pl.BlockSpec(memory_space=pltpu.MemorySpace.SMEM),   # 1/exp(beta)
            pl.BlockSpec(block_shape, index_map),                # x tile
        ],
        out_specs=pl.BlockSpec(block_shape, index_map),
        compiler_params=pltpu.CompilerParams(
            dimension_semantics=("parallel",),
            vmem_limit_bytes=vmem_limit,
        ),
    )(alpha_s, inv_scale_s, x2d)

    return y2d.reshape(orig_shape)       # free (no padding was added)


if __name__ == "__main__":
    key = jax.random.PRNGKey(0)
    k_x, k_alpha = jax.random.split(key)

    # x: [batch=2, channels=4, 16, 16]; SoftCompare is elementwise over x.
    x = jax.random.normal(k_x, (2, 4, 16, 16), dtype=jnp.float32)
    # alpha=None in the module -> normal(0, 1) init; beta=None -> 0.0 init.
    alpha = jax.random.normal(k_alpha, (1,), dtype=jnp.float32)
    beta = jnp.zeros((1,), dtype=jnp.float32)

    out = soft_compare_forward(x, alpha, beta)
    out = jax.block_until_ready(out)

    # Pure-JAX reference.
    ref = jax.nn.sigmoid((x - alpha[0]) / jnp.exp(beta[0]))
    assert out.shape == ref.shape
    assert out.dtype == ref.dtype
    assert jnp.allclose(out, ref, atol=2e-6, rtol=2e-5), "mismatch vs reference"

    print("KERNEL_OK")
</pallas_src>

<mosaic_0001>
module attributes {stable_mosaic.version = 11 : i64} {
  func.func @_soft_compare_kernel(%arg0: i32, %arg1: memref<1xf32, #tpu.memory_space<smem>>, %arg2: memref<1xf32, #tpu.memory_space<smem>>, %arg3: memref<2x1024xf32, #tpu.memory_space<vmem>>, %arg4: memref<2x1024xf32, #tpu.memory_space<vmem>>) attributes {dimension_semantics = [#tpu.dimension_semantics<parallel>], iteration_bounds = array<i64: 1>, scalar_prefetch = 0 : i64, scratch_operands = 0 : i64, tpu.core_type = #tpu.core_type<tc>, window_params = [{transform_indices = @transform_0, window_bounds = array<i64: 1>}, {transform_indices = @transform_1, window_bounds = array<i64: 1>}, {transform_indices = @transform_2, window_bounds = array<i64: 2, 1024>}, {transform_indices = @transform_3, window_bounds = array<i64: 2, 1024>}]} {
    %c0 = arith.constant 0 : index
    %0 = memref.load %arg1[%c0] : memref<1xf32, #tpu.memory_space<smem>>
    %c0_0 = arith.constant 0 : index
    %1 = memref.load %arg2[%c0_0] : memref<1xf32, #tpu.memory_space<smem>>
    %c0_1 = arith.constant 0 : index
    %c0_2 = arith.constant 0 : index
    %2 = vector.load %arg3[%c0_1, %c0_2] : memref<2x1024xf32, #tpu.memory_space<vmem>>, vector<2x1024xf32>
    %3 = vector.broadcast %0 : f32 to vector<2x1024xf32>
    %4 = arith.subf %2, %3 : vector<2x1024xf32>
    %5 = vector.broadcast %1 : f32 to vector<2x1024xf32>
    %6 = arith.mulf %4, %5 : vector<2x1024xf32>
    %cst = arith.constant 5.000000e-01 : f32
    %7 = vector.broadcast %cst : f32 to vector<2x1024xf32>
    %8 = arith.mulf %7, %6 : vector<2x1024xf32>
    %9 = math.tanh %8 : vector<2x1024xf32>
    %cst_3 = arith.constant 5.000000e-01 : f32
    %10 = vector.broadcast %cst_3 : f32 to vector<2x1024xf32>
    %11 = arith.mulf %10, %9 : vector<2x1024xf32>
    %cst_4 = arith.constant 5.000000e-01 : f32
    %12 = vector.broadcast %cst_4 : f32 to vector<2x1024xf32>
    %13 = arith.addf %11, %12 : vector<2x1024xf32>
    %c0_5 = arith.constant 0 : index
    %c0_6 = arith.constant 0 : index
    %14 = vector.load %arg4[%c0_5, %c0_6] : memref<2x1024xf32, #tpu.memory_space<vmem>>, vector<2x1024xf32>
    tpu.vector_store %arg4[%c0_5, %c0_6], %13 {strides = array<i32>} : memref<2x1024xf32, #tpu.memory_space<vmem>>, vector<2x1024xf32>,
    return
  }
  func.func @transform_0(%arg0: i32) -> i32 {
    %c0_i32 = arith.constant 0 : i32
    %c0_i32_0 = arith.constant 0 : i32
    return %c0_i32 : i32
  }
  func.func @transform_1(%arg0: i32) -> i32 {
    %c0_i32 = arith.constant 0 : i32
    %c0_i32_0 = arith.constant 0 : i32
    return %c0_i32 : i32
  }
  func.func @transform_2(%arg0: i32) -> (i32, i32) {
    %c0_i32 = arith.constant 0 : i32
    %c0_i32_0 = arith.constant 0 : i32
    return %arg0, %c0_i32 : i32, i32
  }
  func.func @transform_3(%arg0: i32) -> (i32, i32) {
    %c0_i32 = arith.constant 0 : i32
    %c0_i32_0 = arith.constant 0 : i32
    return %arg0, %c0_i32 : i32, i32
  }
}

</mosaic_0001>

<bundles_post_ra>
// kernel: tpu_custom_call.1
= control target key start
LH: loop header
LB: loop body
LE: loop exit
PB: predicated region body
PF: predicated region fallthrough
CT: control target
= control target key end

     0   :  { %10 = vsyncpa [#allocation5], 0  ;;  %s170_s0 = inlined_call_operand.<no memory space> [shape: f32[1], index: 0, kind: input, shape index: {}]   ;;  %s171_s1 = inlined_call_operand.<no memory space> [shape: f32[1], index: 1, kind: input, shape index: {}]   ;;  %s172_s2 = inlined_call_operand.hbm [shape: f32[2,1024], index: 2, kind: input, shape index: {}]   ;;  %s173_s3 = inlined_call_operand.hbm [shape: f32[2,1024], index: 3, kind: output, shape index: {}]  }
   0x1   :  { %11 = vsyncpa [#allocation6], 0  ;;  %s118_s12 = smov [#allocation4]   ;;  %s70_s16 = scalar_lea.hbm %s172_s2, 256 }
   0x2   :  { %s22_s13 = sshll.u32 %s118_s12, 4  ;;  %p71_p0 = scmp.ne.s32.totalorder %s172_s2, %s70_s16  ;;  %s23_s13 = int_to_ptr.vmem [resolvable:$true] %s22_s13 }
   0x3   :  { %p74_p1 = scmp.lt.u32.totalorder %s70_s16, %s172_s2 }
   0x5   :  { %p76_p2 = pnand %p74_p1, %p71_p0 }
   0x7   :  { %79 = shalt.err (!%p76_p2)
}
   0x8   :  { %s80_s21 = scalar_lea.vmem %s23_s13, 256  ;;  %p85_p4 = scmp.lt.s32.totalorder %s23_s13, %s23_s13 }
   0x9   :  { %p81_p3 = scmp.ne.s32.totalorder %s23_s13, %s80_s21  ;;  %p86_p5 = scmp.lt.s32.totalorder %s80_s21, %s80_s21 }
   0xb   :  { %p87_p6 = por %p86_p5, %p85_p4 }
   0xd   :  { %p88_p7 = pnand %p87_p6, %p81_p3 }
   0xf   :  { %91 = shalt.err (!%p88_p7)
}
  0x10   :  { %25 = dma.hbm_to_vmem [thread:$0]  %s172_s2, 256, %s23_s13, [#allocation5]  }
  0x11   :  { %114 = dma.done.wait [#allocation5], 256  }
  0x12   :  { %115 = vsyncadd [#allocation5], 4294967040  ;;  %v33_v0 = vstv %s170_s0  ;;  %v31_v1 = vld [vmem:[#allocation4] sm:$0xff]  ;;  %v36_v2 = vstv %s171_s1  ;;  %v32_v3 = vld [vmem:[#allocation4 + $0x8] sm:$0xff]  ;;  %s119_s2 = smov [#allocation7]  }
  0x13   :  { %v34_v4 = vsub.f32 %v31_v1, %v33_v0  ;;  %v35_v5 = vsub.f32 %v32_v3, %v33_v0  ;;  %s55_s28 = sshll.u32 %s119_s2, 4  ;;  %s56_s28 = int_to_ptr.vmem [resolvable:$true] %s55_s28 }
  0x14   :  { %s92_s0 = scalar_lea.vmem %s56_s28, 256  ;;  %p97_p9 = scmp.lt.s32.totalorder %s56_s28, %s56_s28 }
  0x15   :  { %v37_v6 = vmul.f32 %v36_v2, %v34_v4  ;;  %v38_v7 = vmul.f32 %v36_v2, %v35_v5  ;;  %p93_p8 = scmp.ne.s32.totalorder %s56_s28, %s92_s0  ;;  %p98_p10 = scmp.lt.s32.totalorder %s92_s0, %s92_s0 }
  0x17   :  { %v39_v8 = vmul.f32 0.5, %v37_v6  ;;  %v40_v9 = vmul.f32 0.5, %v38_v7  ;;  %p99_p11 = por %p98_p10, %p97_p9 }
  0x19   :  { %66 = vtanh.f32 %v39_v8  ;;  %p100_p12 = pnand %p99_p11, %p93_p8 }
  0x1a   :  { %68 = vtanh.f32 %v40_v9 }
  0x23   :  { %v67_v10 = vpop.eup %66 }
  0x24   :  { %v69_v11 = vpop.eup %68  ;;  %v43_v12 = vmul.f32 0.5, %v67_v10 }
  0x25   :  { %v44_v13 = vmul.f32 0.5, %v69_v11 }
  0x26   :  { %v45_v14 = vadd.f32 0.5, %v43_v12 }
  0x27   :  { %v46_v15 = vadd.f32 0.5, %v44_v13 }
  0x28   :  { %47 = vst [vmem:[#allocation7] sm:$0xff] %v45_v14 }
  0x29   :  { %48 = vst [vmem:[#allocation7 + $0x8] sm:$0xff] %v46_v15 }
  0x2a   :  { %103 = shalt.err (!%p100_p12)
}
  0x2b   :  { %s104_s30 = scalar_lea.hbm %s173_s3, 256 }
  0x2c   :  { %p105_p13 = scmp.ne.s32.totalorder %s173_s3, %s104_s30  ;;  %p108_p0 = scmp.lt.u32.totalorder %s104_s30, %s173_s3 }
  0x2e   :  { %p110_p1 = pnand %p108_p0, %p105_p13 }
  0x30   :  { %113 = shalt.err (!%p110_p1)
}
  0x31   :  { %58 = dma.vmem_to_hbm [thread:$0]  %s56_s28, 256, %s173_s3, [#allocation6]  }
  0x32   :  { %116 = dma.done.wait [#allocation6], 256  }
  0x33   :  { %117 = vsyncadd [#allocation6], 4294967040 }
  0x34   :  { %62 = vsyncpa [#allocation5], 1 }
  0x35   :  { %63 = vsyncpa [#allocation6], 1 }

</bundles_post_ra>
